<compile_context>
chip_gen: v7x
topology: tpu7x:2x2x1
jax: 0.10.0
libtpu: 0.0.40
codegen_flags: <defaults>
</compile_context>

<pallas_src>
import functools

import jax
import jax.numpy as jnp
from jax.experimental import pallas as pl
from jax.experimental.pallas import tpu as pltpu


def _conv_block_kernel(pos_ref, x_ref, w1_ref, b1_ref, w2_ref, b2_ref, o_ref,
                       *, H, W):
    """One batch element per grid step; spatial dims flattened on lanes.

    pos_ref : (2, H*W) int32   row 0 = w coordinate, row 1 = h coordinate
    x_ref   : (1, Cin, H*W)    input image (flat NCHW)
    w1_ref  : (Cout, 9*Cin)    conv1 taps (BN1 scale folded in)
    b1_ref  : (Cout, 1)        BN1 bias
    w2_ref  : (Cout, 9*Cout)   conv2 taps (BN2 scale folded in)
    b2_ref  : (Cout, 1)        BN2 bias
    o_ref   : (1, Cout, H*W)
    """
    L = H * W
    wpos = pos_ref[0:1, :]                      # (1, L) int32
    hpos = pos_ref[1:2, :]
    first_col = wpos == 0
    last_col = wpos == (W - 1)
    first_row = hpos == 0
    last_row = hpos == (H - 1)

    def shift3(f, step, lo_mask, hi_mask):
        # f[:, i] = img[h, w] (row-major).  Return the three reflect-padded
        # unit shifts (-1, 0, +1) along one spatial axis built from flat-lane
        # rolls (XLU) + a boundary fix-up select -- no slicing / reshaping.
        fwd = pltpu.roll(f, (L - step) % L, axis=1)   # f[:, i + step]
        bwd = pltpu.roll(f, step % L, axis=1)         # f[:, i - step]
        minus = jnp.where(lo_mask, fwd, bwd)          # offset -1 (reflect low edge)
        plus = jnp.where(hi_mask, bwd, fwd)           # offset +1 (reflect high edge)
        return minus, f, plus

    def conv3x3(f, w_ref):
        # f: (C, L).  Build im2col (9*C, L), one MXU matmul -> (Cout, L) f32.
        w_taps = shift3(f, 1, first_col, last_col)               # kw = 0, 1, 2
        rows = [None] * 9
        for kw in range(3):
            h_taps = shift3(w_taps[kw], W, first_row, last_row)  # kh = 0, 1, 2
            for kh in range(3):
                rows[kh * 3 + kw] = h_taps[kh]
        col = jnp.concatenate(rows, axis=0)                      # (9*C, L)
        return jnp.dot(w_ref[...], col, preferred_element_type=jnp.float32)

    x = x_ref[0]                                                  # (Cin, L)

    # conv1 (+ folded BN1 scale) -> bias -> LeakyReLU   (bias/act in f32)
    y = conv3x3(x, w1_ref) + b1_ref[...]
    y = jnp.where(y > 0, y, 0.01 * y)
    # TODO(synk): Dropout2d(0.3) is training-time stochastic; identity in eval.

    # conv2 (+ folded BN2 scale) -> bias -> LeakyReLU
    y = conv3x3(y.astype(x.dtype), w2_ref) + b2_ref[...]
    y = jnp.where(y > 0, y, 0.01 * y)

    o_ref[0] = y.astype(o_ref.dtype)                              # lane-dense store


def conv_block_forward(x_nchw, w1, g1, beta1, m1, v1,
                       w2, g2, beta2, m2, v2, eps=1e-5,
                       compute_dtype=jnp.float32):
    """Pallas-backed inference forward of Conv_Block.

    x_nchw : (N, Cin, H, W)      (H, W >= 2)
    w1     : (Cout, Cin, 3, 3)   first conv weight (PyTorch OIHW, bias=False)
    w2     : (Cout, Cout, 3, 3)  second conv weight
    g*, beta*, m*, v* : (Cout,)  BatchNorm gamma / beta / running mean / var
    compute_dtype : matmul operand dtype (use jnp.bfloat16 on v6e/v7x; the
                    accumulation, bias add and LeakyReLU stay f32).
    returns: (N, Cout, H, W)
    """
    N, Cin, H, W = x_nchw.shape
    Cout = w1.shape[0]
    L = H * W

    # Minormost-dims-only reshape: layout-preserving, no extra HBM traffic.
    x_flat = x_nchw.reshape(N, Cin, L).astype(compute_dtype)

    # Fold eval-mode BN into per-output-channel scale (folded into the conv
    # weights, in f32) and a single bias.
    s1 = (g1 / jnp.sqrt(v1 + eps)).astype(jnp.float32)
    b1 = (beta1 - m1 * s1).reshape(Cout, 1).astype(jnp.float32)
    s2 = (g2 / jnp.sqrt(v2 + eps)).astype(jnp.float32)
    b2 = (beta2 - m2 * s2).reshape(Cout, 1).astype(jnp.float32)

    # (Cout, Cin, 3, 3) -> (Cout, kh, kw, Cin) -> (Cout, 9*Cin).  Column order
    # (kh, kw, ci) matches the im2col row order built inside the kernel.
    w1_mat = (jnp.transpose(w1.astype(jnp.float32), (0, 2, 3, 1))
              * s1[:, None, None, None]).reshape(Cout, 9 * Cin).astype(compute_dtype)
    w2_mat = (jnp.transpose(w2.astype(jnp.float32), (0, 2, 3, 1))
              * s2[:, None, None, None]).reshape(Cout, 9 * Cout).astype(compute_dtype)

    # Flat-lane -> (w, h) coordinates, consumed in-kernel for the reflect
    # boundary masks (passed as data: no in-kernel integer div/mod needed).
    lane = jnp.arange(L, dtype=jnp.int32)
    pos = jnp.stack([lane % W, lane // W], axis=0)                # (2, L) int32

    itemsize = jnp.dtype(compute_dtype).itemsize
    flops = 2 * N * L * 9 * (Cin * Cout + Cout * Cout)
    bytes_accessed = (N * Cin * L * itemsize
                      + N * Cout * L * jnp.dtype(x_nchw.dtype).itemsize
                      + (w1_mat.size + w2_mat.size) * itemsize
                      + (b1.size + b2.size) * 4 + pos.size * 4)

    out_flat = pl.pallas_call(
        functools.partial(_conv_block_kernel, H=H, W=W),
        out_shape=jax.ShapeDtypeStruct((N, Cout, L), x_nchw.dtype),
        grid_spec=pltpu.PrefetchScalarGridSpec(
            num_scalar_prefetch=0,
            grid=(N,),
            in_specs=[
                pl.BlockSpec((2, L), lambda n: (0, 0)),
                pl.BlockSpec((1, Cin, L), lambda n: (n, 0, 0)),
                pl.BlockSpec((Cout, 9 * Cin), lambda n: (0, 0)),
                pl.BlockSpec((Cout, 1), lambda n: (0, 0)),
                pl.BlockSpec((Cout, 9 * Cout), lambda n: (0, 0)),
                pl.BlockSpec((Cout, 1), lambda n: (0, 0)),
            ],
            out_specs=pl.BlockSpec((1, Cout, L), lambda n: (n, 0, 0)),
        ),
        compiler_params=pltpu.CompilerParams(
            dimension_semantics=("parallel",),
        ),
        cost_estimate=pl.CostEstimate(
            flops=int(flops), transcendentals=0,
            bytes_accessed=int(bytes_accessed)),
    )(pos, x_flat, w1_mat, b1, w2_mat, b2)

    # TODO(synk): for production UNet shapes add an H-tiling grid axis with a
    # 1-row halo so double-buffered blocks fit v7x's 64 MiB VMEM and give
    # each TensorCore several pipelined steps.
    return out_flat.reshape(N, Cout, H, W)


if __name__ == "__main__":
    key = jax.random.PRNGKey(0)
    ks = jax.random.split(key, 12)

    N, Cin, Cout, H, W = 2, 4, 8, 16, 16
    eps = 1e-5

    x = jax.random.normal(ks[0], (N, Cin, H, W), dtype=jnp.float32)
    w1 = jax.random.normal(ks[1], (Cout, Cin, 3, 3), dtype=jnp.float32) * 0.1
    w2 = jax.random.normal(ks[2], (Cout, Cout, 3, 3), dtype=jnp.float32) * 0.1
    g1 = 1.0 + 0.1 * jax.random.normal(ks[3], (Cout,), dtype=jnp.float32)
    beta1 = 0.1 * jax.random.normal(ks[4], (Cout,), dtype=jnp.float32)
    m1 = 0.1 * jax.random.normal(ks[5], (Cout,), dtype=jnp.float32)
    v1 = jax.random.uniform(ks[6], (Cout,), jnp.float32, 0.5, 1.5)
    g2 = 1.0 + 0.1 * jax.random.normal(ks[7], (Cout,), dtype=jnp.float32)
    beta2 = 0.1 * jax.random.normal(ks[8], (Cout,), dtype=jnp.float32)
    m2 = 0.1 * jax.random.normal(ks[9], (Cout,), dtype=jnp.float32)
    v2 = jax.random.uniform(ks[10], (Cout,), jnp.float32, 0.5, 1.5)

    out = conv_block_forward(x, w1, g1, beta1, m1, v1, w2, g2, beta2, m2, v2, eps)
    out = jax.block_until_ready(out)

    # Pure-JAX reference of the same inference-mode forward.
    def leaky(z):
        return jnp.where(z > 0, z, 0.01 * z)

    def bn(z, g, b, m, v):
        return ((z - m[None, :, None, None])
                / jnp.sqrt(v + eps)[None, :, None, None]
                * g[None, :, None, None] + b[None, :, None, None])

    xp = jnp.pad(x, ((0, 0), (0, 0), (1, 1), (1, 1)), mode="reflect")
    y = jax.lax.conv_general_dilated(
        xp, w1, (1, 1), "VALID", dimension_numbers=("NCHW", "OIHW", "NCHW"),
        precision=jax.lax.Precision.HIGHEST)
    y = leaky(bn(y, g1, beta1, m1, v1))
    yp = jnp.pad(y, ((0, 0), (0, 0), (1, 1), (1, 1)), mode="reflect")
    y2 = jax.lax.conv_general_dilated(
        yp, w2, (1, 1), "VALID", dimension_numbers=("NCHW", "OIHW", "NCHW"),
        precision=jax.lax.Precision.HIGHEST)
    ref = leaky(bn(y2, g2, beta2, m2, v2))

    assert out.shape == (N, Cout, H, W), out.shape
    err = float(jnp.max(jnp.abs(out - ref)))
    assert jnp.allclose(out, ref, atol=1e-3, rtol=1e-3), f"mismatch vs reference: {err}"

    print("KERNEL_OK")
</pallas_src>

<mosaic_0001>
module attributes {stable_mosaic.version = 11 : i64} {
  func.func @_conv_block_kernel(%arg0: i32, %arg1: memref<2x256xi32, #tpu.memory_space<vmem>>, %arg2: memref<1x4x256xf32, #tpu.memory_space<vmem>>, %arg3: memref<8x36xf32, #tpu.memory_space<vmem>>, %arg4: memref<8x1xf32, #tpu.memory_space<vmem>>, %arg5: memref<8x72xf32, #tpu.memory_space<vmem>>, %arg6: memref<8x1xf32, #tpu.memory_space<vmem>>, %arg7: memref<1x8x256xf32, #tpu.memory_space<vmem>>) attributes {dimension_semantics = [#tpu.dimension_semantics<parallel>], iteration_bounds = array<i64: 2>, scalar_prefetch = 0 : i64, scratch_operands = 0 : i64, tpu.core_type = #tpu.core_type<tc>, window_params = [{pipeline_mode = #tpu.pipeline_mode<synchronous>, transform_indices = @transform_0, window_bounds = array<i64: 2, 256>}, {transform_indices = @transform_1, window_bounds = array<i64: 1, 4, 256>}, {pipeline_mode = #tpu.pipeline_mode<synchronous>, transform_indices = @transform_2, window_bounds = array<i64: 8, 36>}, {pipeline_mode = #tpu.pipeline_mode<synchronous>, transform_indices = @transform_3, window_bounds = array<i64: 8, 1>}, {pipeline_mode = #tpu.pipeline_mode<synchronous>, transform_indices = @transform_4, window_bounds = array<i64: 8, 72>}, {pipeline_mode = #tpu.pipeline_mode<synchronous>, transform_indices = @transform_5, window_bounds = array<i64: 8, 1>}, {transform_indices = @transform_6, window_bounds = array<i64: 1, 8, 256>}]} {
    %c0 = arith.constant 0 : index
    %c0_0 = arith.constant 0 : index
    %0 = vector.load %arg1[%c0, %c0_0] : memref<2x256xi32, #tpu.memory_space<vmem>>, vector<1x256xi32>
    %c1 = arith.constant 1 : index
    %c0_1 = arith.constant 0 : index
    %1 = vector.load %arg1[%c1, %c0_1] : memref<2x256xi32, #tpu.memory_space<vmem>>, vector<1x256xi32>
    %c0_i32 = arith.constant 0 : i32
    %2 = vector.broadcast %c0_i32 : i32 to vector<1x256xi32>
    %3 = arith.cmpi eq, %0, %2 : vector<1x256xi32>
    %c15_i32 = arith.constant 15 : i32
    %4 = vector.broadcast %c15_i32 : i32 to vector<1x256xi32>
    %5 = arith.cmpi eq, %0, %4 : vector<1x256xi32>
    %c0_i32_2 = arith.constant 0 : i32
    %6 = vector.broadcast %c0_i32_2 : i32 to vector<1x256xi32>
    %7 = arith.cmpi eq, %1, %6 : vector<1x256xi32>
    %c15_i32_3 = arith.constant 15 : i32
    %8 = vector.broadcast %c15_i32_3 : i32 to vector<1x256xi32>
    %9 = arith.cmpi eq, %1, %8 : vector<1x256xi32>
    %c0_4 = arith.constant 0 : index
    %c0_5 = arith.constant 0 : index
    %c0_6 = arith.constant 0 : index
    %10 = vector.load %arg2[%c0_4, %c0_5, %c0_6] : memref<1x4x256xf32, #tpu.memory_space<vmem>>, vector<1x4x256xf32>
    %11 = vector.shape_cast %10 : vector<1x4x256xf32> to vector<4x256xf32>
    %c255_i32 = arith.constant 255 : i32
    %12 = tpu.dynamic_rotate %11 by %c255_i32 dim 1 : vector<4x256xf32>, i32 -> vector<4x256xf32>
    %c1_i32 = arith.constant 1 : i32
    %13 = tpu.dynamic_rotate %11 by %c1_i32 dim 1 : vector<4x256xf32>, i32 -> vector<4x256xf32>
    %14 = vector.shape_cast %3 : vector<1x256xi1> to vector<1x256xi1>
    %15 = vector.broadcast %14 : vector<1x256xi1> to vector<4x256xi1>
    %16 = arith.select %15, %12, %13 : vector<4x256xi1>, vector<4x256xf32>
    %17 = vector.shape_cast %5 : vector<1x256xi1> to vector<1x256xi1>
    %18 = vector.broadcast %17 : vector<1x256xi1> to vector<4x256xi1>
    %19 = arith.select %18, %13, %12 : vector<4x256xi1>, vector<4x256xf32>
    %c240_i32 = arith.constant 240 : i32
    %20 = tpu.dynamic_rotate %16 by %c240_i32 dim 1 : vector<4x256xf32>, i32 -> vector<4x256xf32>
    %c16_i32 = arith.constant 16 : i32
    %21 = tpu.dynamic_rotate %16 by %c16_i32 dim 1 : vector<4x256xf32>, i32 -> vector<4x256xf32>
    %22 = vector.shape_cast %7 : vector<1x256xi1> to vector<1x256xi1>
    %23 = vector.broadcast %22 : vector<1x256xi1> to vector<4x256xi1>
    %24 = arith.select %23, %20, %21 : vector<4x256xi1>, vector<4x256xf32>
    %25 = vector.shape_cast %9 : vector<1x256xi1> to vector<1x256xi1>
    %26 = vector.broadcast %25 : vector<1x256xi1> to vector<4x256xi1>
    %27 = arith.select %26, %21, %20 : vector<4x256xi1>, vector<4x256xf32>
    %c240_i32_7 = arith.constant 240 : i32
    %28 = tpu.dynamic_rotate %11 by %c240_i32_7 dim 1 : vector<4x256xf32>, i32 -> vector<4x256xf32>
    %c16_i32_8 = arith.constant 16 : i32
    %29 = tpu.dynamic_rotate %11 by %c16_i32_8 dim 1 : vector<4x256xf32>, i32 -> vector<4x256xf32>
    %30 = vector.shape_cast %7 : vector<1x256xi1> to vector<1x256xi1>
    %31 = vector.broadcast %30 : vector<1x256xi1> to vector<4x256xi1>
    %32 = arith.select %31, %28, %29 : vector<4x256xi1>, vector<4x256xf32>
    %33 = vector.shape_cast %9 : vector<1x256xi1> to vector<1x256xi1>
    %34 = vector.broadcast %33 : vector<1x256xi1> to vector<4x256xi1>
    %35 = arith.select %34, %29, %28 : vector<4x256xi1>, vector<4x256xf32>
    %c240_i32_9 = arith.constant 240 : i32
    %36 = tpu.dynamic_rotate %19 by %c240_i32_9 dim 1 : vector<4x256xf32>, i32 -> vector<4x256xf32>
    %c16_i32_10 = arith.constant 16 : i32
    %37 = tpu.dynamic_rotate %19 by %c16_i32_10 dim 1 : vector<4x256xf32>, i32 -> vector<4x256xf32>
    %38 = vector.shape_cast %7 : vector<1x256xi1> to vector<1x256xi1>
    %39 = vector.broadcast %38 : vector<1x256xi1> to vector<4x256xi1>
    %40 = arith.select %39, %36, %37 : vector<4x256xi1>, vector<4x256xf32>
    %41 = vector.shape_cast %9 : vector<1x256xi1> to vector<1x256xi1>
    %42 = vector.broadcast %41 : vector<1x256xi1> to vector<4x256xi1>
    %43 = arith.select %42, %37, %36 : vector<4x256xi1>, vector<4x256xf32>
    %44 = tpu.concatenate %24, %32, %40, %16, %11, %19, %27, %35, %43 in 0 : vector<4x256xf32>, vector<4x256xf32>, vector<4x256xf32>, vector<4x256xf32>, vector<4x256xf32>, vector<4x256xf32>, vector<4x256xf32>, vector<4x256xf32>, vector<4x256xf32> -> vector<36x256xf32>
    %c0_11 = arith.constant 0 : index
    %c0_12 = arith.constant 0 : index
    %45 = vector.load %arg3[%c0_11, %c0_12] : memref<8x36xf32, #tpu.memory_space<vmem>>, vector<8x36xf32>
    %cst = arith.constant dense<0.000000e+00> : vector<8x256xf32>
    %46 = tpu.matmul %45, %44, %cst {dimension_numbers = #tpu.dot_dimension_numbers<[1], [0], [0], [1], [0, 0, 1, 1], [], []>} : vector<8x36xf32>, vector<36x256xf32>, vector<8x256xf32> -> vector<8x256xf32>
    %c0_13 = arith.constant 0 : index
    %c0_14 = arith.constant 0 : index
    %47 = vector.load %arg4[%c0_13, %c0_14] : memref<8x1xf32, #tpu.memory_space<vmem>>, vector<8x1xf32>
    %48 = vector.broadcast %47 : vector<8x1xf32> to vector<8x256xf32>
    %49 = arith.addf %46, %48 : vector<8x256xf32>
    %cst_15 = arith.constant 0.000000e+00 : f32
    %50 = vector.broadcast %cst_15 : f32 to vector<8x256xf32>
    %51 = arith.cmpf ogt, %49, %50 : vector<8x256xf32>
    %cst_16 = arith.constant 0.00999999977 : f32
    %52 = vector.broadcast %cst_16 : f32 to vector<8x256xf32>
    %53 = arith.mulf %52, %49 : vector<8x256xf32>
    %54 = arith.select %51, %49, %53 : vector<8x256xi1>, vector<8x256xf32>
    %c255_i32_17 = arith.constant 255 : i32
    %55 = tpu.dynamic_rotate %54 by %c255_i32_17 dim 1 : vector<8x256xf32>, i32 -> vector<8x256xf32>
    %c1_i32_18 = arith.constant 1 : i32
    %56 = tpu.dynamic_rotate %54 by %c1_i32_18 dim 1 : vector<8x256xf32>, i32 -> vector<8x256xf32>
    %57 = vector.shape_cast %3 : vector<1x256xi1> to vector<1x256xi1>
    %58 = vector.broadcast %57 : vector<1x256xi1> to vector<8x256xi1>
    %59 = arith.select %58, %55, %56 : vector<8x256xi1>, vector<8x256xf32>
    %60 = vector.shape_cast %5 : vector<1x256xi1> to vector<1x256xi1>
    %61 = vector.broadcast %60 : vector<1x256xi1> to vector<8x256xi1>
    %62 = arith.select %61, %56, %55 : vector<8x256xi1>, vector<8x256xf32>
    %c240_i32_19 = arith.constant 240 : i32
    %63 = tpu.dynamic_rotate %59 by %c240_i32_19 dim 1 : vector<8x256xf32>, i32 -> vector<8x256xf32>
    %c16_i32_20 = arith.constant 16 : i32
    %64 = tpu.dynamic_rotate %59 by %c16_i32_20 dim 1 : vector<8x256xf32>, i32 -> vector<8x256xf32>
    %65 = vector.shape_cast %7 : vector<1x256xi1> to vector<1x256xi1>
    %66 = vector.broadcast %65 : vector<1x256xi1> to vector<8x256xi1>
    %67 = arith.select %66, %63, %64 : vector<8x256xi1>, vector<8x256xf32>
    %68 = vector.shape_cast %9 : vector<1x256xi1> to vector<1x256xi1>
    %69 = vector.broadcast %68 : vector<1x256xi1> to vector<8x256xi1>
    %70 = arith.select %69, %64, %63 : vector<8x256xi1>, vector<8x256xf32>
    %c240_i32_21 = arith.constant 240 : i32
    %71 = tpu.dynamic_rotate %54 by %c240_i32_21 dim 1 : vector<8x256xf32>, i32 -> vector<8x256xf32>
    %c16_i32_22 = arith.constant 16 : i32
    %72 = tpu.dynamic_rotate %54 by %c16_i32_22 dim 1 : vector<8x256xf32>, i32 -> vector<8x256xf32>
    %73 = vector.shape_cast %7 : vector<1x256xi1> to vector<1x256xi1>
    %74 = vector.broadcast %73 : vector<1x256xi1> to vector<8x256xi1>
    %75 = arith.select %74, %71, %72 : vector<8x256xi1>, vector<8x256xf32>
    %76 = vector.shape_cast %9 : vector<1x256xi1> to vector<1x256xi1>
    %77 = vector.broadcast %76 : vector<1x256xi1> to vector<8x256xi1>
    %78 = arith.select %77, %72, %71 : vector<8x256xi1>, vector<8x256xf32>
    %c240_i32_23 = arith.constant 240 : i32
    %79 = tpu.dynamic_rotate %62 by %c240_i32_23 dim 1 : vector<8x256xf32>, i32 -> vector<8x256xf32>
    %c16_i32_24 = arith.constant 16 : i32
    %80 = tpu.dynamic_rotate %62 by %c16_i32_24 dim 1 : vector<8x256xf32>, i32 -> vector<8x256xf32>
    %81 = vector.shape_cast %7 : vector<1x256xi1> to vector<1x256xi1>
    %82 = vector.broadcast %81 : vector<1x256xi1> to vector<8x256xi1>
    %83 = arith.select %82, %79, %80 : vector<8x256xi1>, vector<8x256xf32>
    %84 = vector.shape_cast %9 : vector<1x256xi1> to vector<1x256xi1>
    %85 = vector.broadcast %84 : vector<1x256xi1> to vector<8x256xi1>
    %86 = arith.select %85, %80, %79 : vector<8x256xi1>, vector<8x256xf32>
    %87 = tpu.concatenate %67, %75, %83, %59, %54, %62, %70, %78, %86 in 0 : vector<8x256xf32>, vector<8x256xf32>, vector<8x256xf32>, vector<8x256xf32>, vector<8x256xf32>, vector<8x256xf32>, vector<8x256xf32>, vector<8x256xf32>, vector<8x256xf32> -> vector<72x256xf32>
    %c0_25 = arith.constant 0 : index
    %c0_26 = arith.constant 0 : index
    %88 = vector.load %arg5[%c0_25, %c0_26] : memref<8x72xf32, #tpu.memory_space<vmem>>, vector<8x72xf32>
    %cst_27 = arith.constant dense<0.000000e+00> : vector<8x256xf32>
    %89 = tpu.matmul %88, %87, %cst_27 {dimension_numbers = #tpu.dot_dimension_numbers<[1], [0], [0], [1], [0, 0, 1, 1], [], []>} : vector<8x72xf32>, vector<72x256xf32>, vector<8x256xf32> -> vector<8x256xf32>
    %c0_28 = arith.constant 0 : index
    %c0_29 = arith.constant 0 : index
    %90 = vector.load %arg6[%c0_28, %c0_29] : memref<8x1xf32, #tpu.memory_space<vmem>>, vector<8x1xf32>
    %91 = vector.broadcast %90 : vector<8x1xf32> to vector<8x256xf32>
    %92 = arith.addf %89, %91 : vector<8x256xf32>
    %cst_30 = arith.constant 0.000000e+00 : f32
    %93 = vector.broadcast %cst_30 : f32 to vector<8x256xf32>
    %94 = arith.cmpf ogt, %92, %93 : vector<8x256xf32>
    %cst_31 = arith.constant 0.00999999977 : f32
    %95 = vector.broadcast %cst_31 : f32 to vector<8x256xf32>
    %96 = arith.mulf %95, %92 : vector<8x256xf32>
    %97 = arith.select %94, %92, %96 : vector<8x256xi1>, vector<8x256xf32>
    %c0_32 = arith.constant 0 : index
    %c0_33 = arith.constant 0 : index
    %c0_34 = arith.constant 0 : index
    %98 = vector.load %arg7[%c0_32, %c0_33, %c0_34] : memref<1x8x256xf32, #tpu.memory_space<vmem>>, vector<1x8x256xf32>
    %99 = vector.shape_cast %98 : vector<1x8x256xf32> to vector<8x256xf32>
    %100 = vector.shape_cast %97 : vector<8x256xf32> to vector<1x8x256xf32>
    tpu.vector_store %arg7[%c0_32, %c0_33, %c0_34], %100 {strides = array<i32>} : memref<1x8x256xf32, #tpu.memory_space<vmem>>, vector<1x8x256xf32>,
    return
  }
  func.func @transform_0(%arg0: i32) -> (i32, i32) {
    %c0_i32 = arith.constant 0 : i32
    %c0_i32_0 = arith.constant 0 : i32
    %c0_i32_1 = arith.constant 0 : i32
    return %c0_i32, %c0_i32_0 : i32, i32
  }
  func.func @transform_1(%arg0: i32) -> (i32, i32, i32) {
    %c0_i32 = arith.constant 0 : i32
    %c0_i32_0 = arith.constant 0 : i32
    %c0_i32_1 = arith.constant 0 : i32
    return %arg0, %c0_i32, %c0_i32_0 : i32, i32, i32
  }
  func.func @transform_2(%arg0: i32) -> (i32, i32) {
    %c0_i32 = arith.constant 0 : i32
    %c0_i32_0 = arith.constant 0 : i32
    %c0_i32_1 = arith.constant 0 : i32
    return %c0_i32, %c0_i32_0 : i32, i32
  }
  func.func @transform_3(%arg0: i32) -> (i32, i32) {
    %c0_i32 = arith.constant 0 : i32
    %c0_i32_0 = arith.constant 0 : i32
    %c0_i32_1 = arith.constant 0 : i32
    return %c0_i32, %c0_i32_0 : i32, i32
  }
  func.func @transform_4(%arg0: i32) -> (i32, i32) {
    %c0_i32 = arith.constant 0 : i32
    %c0_i32_0 = arith.constant 0 : i32
    %c0_i32_1 = arith.constant 0 : i32
    return %c0_i32, %c0_i32_0 : i32, i32
  }
  func.func @transform_5(%arg0: i32) -> (i32, i32) {
    %c0_i32 = arith.constant 0 : i32
    %c0_i32_0 = arith.constant 0 : i32
    %c0_i32_1 = arith.constant 0 : i32
    return %c0_i32, %c0_i32_0 : i32, i32
  }
  func.func @transform_6(%arg0: i32) -> (i32, i32, i32) {
    %c0_i32 = arith.constant 0 : i32
    %c0_i32_0 = arith.constant 0 : i32
    %c0_i32_1 = arith.constant 0 : i32
    return %arg0, %c0_i32, %c0_i32_0 : i32, i32, i32
  }
}

</mosaic_0001>

<bundles_post_ra>
// kernel: tpu_custom_call.1
= control target key start
LH: loop header
LB: loop body
LE: loop exit
PB: predicated region body
PF: predicated region fallthrough
CT: control target
= control target key end

     0   :  { %11 = vsyncpa [#allocation3], 0  ;;  %s1444_s0 = inlined_call_operand.hbm [shape: s32[2,256], index: 0, kind: input, shape index: {}]   ;;  %s1445_s1 = inlined_call_operand.vmem [shape: f32[2,4,256], index: 1, kind: input, shape index: {}]   ;;  %s1446_s2 = inlined_call_operand.vmem [shape: f32[8,36], index: 2, kind: input, shape index: {}]   ;;  %s1447_s3 = inlined_call_operand.vmem [shape: f32[8,1], index: 3, kind: input, shape index: {}]   ;;  %s1448_s4 = inlined_call_operand.vmem [shape: f32[8,72], index: 4, kind: input, shape index: {}]   ;;  %s1449_s5 = inlined_call_operand.vmem [shape: f32[8,1], index: 5, kind: input, shape index: {}]   ;;  %s1450_s6 = inlined_call_operand.hbm [shape: f32[2,8,256], index: 6, kind: output, shape index: {}]  }
   0x1   :  { %12 = vsyncpa [#allocation4], 0 }
   0x2   :  { %14 = vsyncpa [#allocation4 + $0x1], 0  ;;  %s1036_s21 = smov 0   ;;  %s1038_s22 = smov 0  }
   0x3   :  { %s1040_s23 = smov 0   ;;  %s1042_s24 = smov 0  }
   0x4 LB: > { %s1057_s25 = sadd.s32 4294967295, %s991_s24   ;;  %s755_s26 = sadd.s32 4294967294, %s991_s24   ;;  %s991_s24 = sphi %s1042_s24, %s1482_s24   ;;  %s987_s23 = sphi %s1040_s23, %s1481_s23   ;;  %s983_s22 = sphi %s1038_s22, %s1480_s22   ;;  %s979_s21 = sphi %s1036_s21, %s1479_s21  }
   0x5   : > { %s1061_s27 = sadd.s32 1, %s991_s24   ;;  %s158_s28 = sadd.s32 1, %s987_s23 }
   0x6   : > { %s155_s29 = ssub.s32 %s991_s24, %s1061_s27  ;;  %p168_p0 = scmp.ne.s32.totalorder %s987_s23, %s983_s22 }
   0x7   : > { %p156_p1 = scmp.eq.s32.totalorder %s155_s29, 0  ;;  %p169_p2 = scmp.eq.s32.totalorder %s1057_s25, 1 }
   0x8   : > { %p174_p3 = scmp.ne.s32.totalorder %s983_s22, %s979_s21  ;;  %p175_p4 = scmp.eq.s32.totalorder %s755_s26, 1 }
   0x9   : > { %s1072_s30 = scalar_select %p156_p1, %s987_s23, %s158_s28  }
   0xa   : > { %p1074_p5 = por %p169_p2, %p168_p0  ;;  %p1078_p6 = por %p175_p4, %p174_p3 }
   0xb   : > { %p756_p7 = scmp.ge.s32.totalorder %s991_s24, 1  ;;  %p182_p8 = scmp.lt.s32.totalorder %s991_s24, 3 }
   0xc   : > { %s1454_s7 = scalar_select %p1074_p5, 1, 0 }
   0xd   : > { %s1455_s8 = scalar_select %p1078_p6, 1, 0 }
   0xe   : > { %p1451_p9 = scmp.eq.s32.totalorder %s1057_s25, 0  ;;  %p1085_p10 = pnand %p756_p7, %p182_p8 }
   0xf   : > { %s993_s10 = smov [#allocation2]   ;;  %s897_s15 = scalar_lea.hbm %s1444_s0, 64 }
  0x10   : > { %s1456_s9 = scalar_select %p1085_p10, 1, 0 }
  0x11   : > { %s195_s11 = sshll.u32 %s993_s10, 4  ;;  %p805_p11 = pneg %p1085_p10  ;;  %s196_s11 = int_to_ptr.vmem [resolvable:$true] %s195_s11 }
  0x12   : > { %p898_p13 = scmp.ne.s32.totalorder %s1444_s0, %s897_s15  ;;  %p904_p3 = scmp.lt.u32.totalorder %s897_s15, %s1444_s0 }
  0x13   : > { %p1093_p12 = pnand %p1451_p9, %p805_p11 }
  0x15   : > { %p899_p0 = pneg %p1093_p12 }
  0x17   : > { %p900_p1 = pnand %p899_p0, %p898_p13 }
  0x19   : > { %p901_p2 = pneg %p900_p1 }
  0x1b   : > { %p906_p4 = pnand %p904_p3, %p901_p2 }
  0x1d   : > { %909 = shalt.err (!%p906_p4)
}
  0x1e   : > { %s910_s20 = scalar_lea.vmem %s196_s11, 64  ;;  %p918_p9 = scmp.lt.s32.totalorder %s196_s11, %s196_s11 }
  0x1f   : > { %p911_p7 = scmp.ne.s32.totalorder %s196_s11, %s910_s20  ;;  %p919_p6 = scmp.lt.s32.totalorder %s910_s20, %s910_s20 }
  0x21   : > { %p913_p8 = pnand %p911_p7, %p899_p0  ;;  %p920_p5 = por %p919_p6, %p918_p9 }
  0x23   : > { %p914_p11 = pneg %p913_p8 }
  0x25   : > { %p921_p10 = pnand %p920_p5, %p914_p11 }
  0x27   : > { %924 = shalt.err (!%p921_p10)
}
  0x28   : > { %808 = dma.hbm_to_vmem [thread:$0]  (!%p1093_p12), %s1444_s0, 64, %s196_s11, [#allocation3]  }
  0x29   : > { %p1458_p13 = scmp.ne.s32.totalorder %s1456_s9, 0 }
  0x2a   : > { %p1459_p1 = scmp.eq.s32.totalorder (!%p1458_p13), %s1057_s25, 0 }
  0x2b   : > { %228 = sbr.rel (%p1458_p13) target bundleno = 1036 (0x40c), region = 44 }
  0x32   : > { %970 = dma.done.wait (%p1459_p1), [#allocation3], 64   ;;  %p1460_p0 = pmov %p1459_p1 }
  0x33   : > { %p258_p6 = scmp.lt.s32.totalorder %s1057_s25, 1  ;;  %v994_v0 = vmov 0   ;;  %s995_s9 = smov 1   ;;  %v278_v4 = vlaneseq  ;;  %v263_v5 = vld [vmem:[#allocation2] ss:$2 sm:$0x3] }
  0x34   : > { %972 = vsyncadd (%p1460_p0), [#allocation3], 4294967232  ;;  %875 = vset.pattern.permute.xlu0 %v994_v0  ;;  %s996_s14 = smov 127   ;;  %s997_s15 = smov 16   ;;  %vm266_vm0 = vcmp.eq.s32.totalorder %v263_v5, 0  ;;  %vm267_vm1 = vcmp.eq.s32.totalorder %v263_v5, 15 }
  0x35   : > { %s259_s29 = scalar_select %p258_p6, %s1057_s25, 1  ;;  %v292_v6 = vshrl.u32 %v278_v4, 7  ;;  %v290_v9 = vsel %vm266_vm0, 1, %v994_v0  ;;  %v1148_v10 = vand.u32 127, %v278_v4  ;;  %v303_v15 = vsel %vm267_vm1, 1, %v994_v0  ;;  %v422_v34 = vld [vmem:[%s1447_s3] sm:$0xff] }
  0x36   : > { %s998_s16 = smov 112   ;;  %v999_v33 = vmov 0.0   ;;  %v265_v35 = vld [vmem:[#allocation2 + $0x1] ss:$2 sm:$0x3]  ;;  %vm412_vm0 = vcmask 1043456  }
  0x37   : > { %s773_s10 = sshll.u32 %s259_s29, 3  ;;  %v1143_v7 = vsub.s32 0, %v292_v6  ;;  %v1145_v8 = vsub.s32 1, %v292_v6  ;;  %vm287_vm2 = vcmp.lt.s32.totalorder %v1148_v10, 1  ;;  %vm280_vm3 = vcmp.lt.s32.totalorder %v1148_v10, 127  ;;  %502 = vmatprep.mubr.f32.mxu0 %v999_v33  ;;  %654 = vmatprep.mubr.f32.mxu1 %v999_v33  ;;  %v580_v16 = vld [vmem:[%s1449_s5] sm:$0xff] }
  0x38   : > { %s262_s11 = scalar_lea.vmem %s1445_s1, %s773_s10  ;;  %vm269_vm8 = vcmp.eq.s32.totalorder %v265_v35, 15  ;;  %vm268_vm9 = vcmp.eq.s32.totalorder %v265_v35, 0  ;;  %vm320_vm10 = vcmp.lt.s32.totalorder %v1148_v10, 112  ;;  %vm327_vm11 = vcmp.lt.s32.totalorder %v1148_v10, 16  ;;  %s255_s12 = sand.u32 1, %s983_s22  }
  0x39   : > { %v1125_v1 = vld [vmem:[%s262_s11] sm:$0xff]  ;;  %v294_v11 = vrot.slane %v290_v9, %v1143_v7  ;;  %v298_v12 = vrot.slane %v290_v9, %v1145_v8  ;;  %v311_v20 = vrot.slane %v303_v15, %v1145_v8  ;;  %v307_v21 = vrot.slane %v303_v15, %v1143_v7  ;;  %s761_s13 = sshll.u32 %s255_s12, 4  ;;  %s774_s11 = sshll.u32 %s1057_s25, 8 }
  0x3a   : > { %283 = vrot.lane.b32.xlu1 %v1125_v1, %s995_s9  ;;  %274 = vrot.lane.b32.xlu0 %v1125_v1, %s996_s14  ;;  %v1133_v2 = vcombine.high %v1125_v1, %v1125_v1  ;;  %v343_v36 = vsel %vm269_vm8, 1, %v994_v0  ;;  %v330_v40 = vsel %vm268_vm9, 1, %v994_v0  ;;  %vm428_vm1 = vcmask 293888   ;;  %s1402_s17 = scalar_lea.hbm %s1450_s6, %s774_s11  ;;  %s670_s25 = scalar_lea.sflag [#allocation4], %s255_s12 }
  0x3b   : > { %vm1155_vm4 = vcmp.eq.s32.totalorder %v294_v11, 1  ;;  %vm1159_vm5 = vcmp.eq.s32.totalorder %v298_v12, 1  ;;  %vm1185_vm6 = vcmp.eq.s32.totalorder %v311_v20, 1  ;;  %vm1189_vm7 = vcmp.eq.s32.totalorder %v307_v21, 1  ;;  %p1477_p9 = scmp.ne.s32.totalorder %s1454_s7, 0  ;;  %s1000_s19 = smov [#allocation5]  }
  0x3c   : > { %v860_v3 = vpack.i.bf16 %v1133_v2, %v1125_v1  ;;  %v351_v39 = vrot.slane %v343_v36, %v1145_v8  ;;  %v334_v45 = vrot.slane %v330_v40, %v1143_v7  ;;  %v338_v46 = vrot.slane %v330_v40, %v1145_v8  ;;  %s929_s20 = sshll.u32 %s1000_s19, 4  ;;  %s930_s20 = int_to_ptr.vmem [resolvable:$false] %s929_s20 }
  0x3d   : > { %v347_v48 = vrot.slane %v343_v36, %v1143_v7  ;;  %s931_s26 = scalar_lea.vmem %s930_s20, 512 }
  0x3e   : > { %285 = vrot.lane.b32.xlu1 %v1133_v2, %s995_s9  ;;  %276 = vrot.lane.b32.xlu0 %v1133_v2, %s996_s14  ;;  %vm1222_vm12 = vcmp.eq.s32.totalorder %v351_v39, 1  ;;  %vm1232_vm13 = vcmp.eq.s32.totalorder %v334_v45, 1  ;;  %vm1236_vm14 = vcmp.eq.s32.totalorder %v338_v46, 1 }
  0x3f   : > { %vm1240_vm15 = vcmp.eq.s32.totalorder %v347_v48, 1 }
  0x42   : > { %861 = vrot.lane.b32.xlu1 %v860_v3, %s997_s15  ;;  %856 = vrot.lane.b32.xlu0 %v860_v3, %s998_s16 }
  0xac   : > { %v284_v13 = vpop.permute.xlu1 %283  ;;  %v275_v14 = vpop.permute.xlu0 %274 }
  0xb0   : > { %v286_v18 = vpop.permute.xlu1 %285  ;;  %v277_v19 = vpop.permute.xlu0 %276 }
  0xb1   : > { %v288_v22 = vsel %vm287_vm2, %v284_v13, %v286_v18  ;;  %v289_v23 = vsel %vm287_vm2, %v286_v18, %v284_v13  ;;  %v281_v24 = vsel %vm280_vm3, %v275_v14, %v277_v19  ;;  %v282_v25 = vsel %vm280_vm3, %v277_v19, %v275_v14 }
  0xb2   : > { %v1175_v26 = vsel %vm1155_vm4, %v281_v24, %v289_v23  ;;  %v1179_v27 = vsel %vm1159_vm5, %v282_v25, %v288_v22  ;;  %v1195_v31 = vsel %vm1185_vm6, %v288_v22, %v282_v25  ;;  %v1199_v32 = vsel %vm1189_vm7, %v289_v23, %v281_v24 }
  0xb3   : > { %v870_v28 = vpack.i.bf16 %v1179_v27, %v1175_v26  ;;  %v396_v9 = vrot.slane %v1175_v26, 4  ;;  %v403_v11 = vrot.slane %v1195_v31, 4  ;;  %v397_v15 = vrot.slane %v1179_v27, 4 }
  0xb4   : > { %v862_v37 = vpop.permute.xlu1 %861  ;;  %v857_v38 = vpop.permute.xlu0 %856  ;;  %v402_v39 = vrot.slane %v1199_v32, 4 }
  0xb5   : > { %871 = vrot.lane.b32.xlu1 %v870_v28, %s997_s15  ;;  %866 = vrot.lane.b32.xlu0 %v870_v28, %s998_s16  ;;  %v864_v41 = vunpack.i.h.bf16 %v862_v37  ;;  %v863_v42 = vunpack.i.l.bf16 %v862_v37  ;;  %v859_v43 = vunpack.i.h.bf16 %v857_v38  ;;  %v858_v44 = vunpack.i.l.bf16 %v857_v38 }
  0xb6   : > { %v417_v46 = vsel %vm412_vm0, %v1125_v1, %v402_v39 }
  0xb7   : > { %v366_v47 = vsel %vm327_vm11, %v863_v42, %v864_v41  ;;  %v361_v50 = vsel %vm320_vm10, %v859_v43, %v858_v44  ;;  %v367_v57 = vsel %vm327_vm11, %v864_v41, %v863_v42  ;;  %v360_v58 = vsel %vm320_vm10, %v858_v44, %v859_v43 }
  0xb8   : > { %v371_v62 = vsel %vm1222_vm12, %v366_v47, %v361_v50  ;;  %v369_v7 = vsel %vm1236_vm14, %v361_v50, %v366_v47  ;;  %v368_v8 = vsel %vm1232_vm13, %v360_v58, %v367_v57  ;;  %v370_v12 = vsel %vm1240_vm15, %v367_v57, %v360_v58 }
  0xb9   : > { %374 = vrot.lane.b32.xlu1 %v1195_v31, %s998_s16  ;;  %372 = vrot.lane.b32.xlu0 %v1199_v32, %s998_s16  ;;  %v409_v13 = vrot.slane %v371_v62, 4  ;;  %v391_v20 = vrot.slane %v369_v7, 4  ;;  %v390_v22 = vrot.slane %v368_v8, 4  ;;  %v408_v40 = vrot.slane %v370_v12, 4 }
  0xba   : > { %v418_v43 = vsel %vm412_vm0, %v1133_v2, %v403_v11  ;;  %v421_v2 = vld [vmem:[%s1446_s2] sm:$0xff] }
  0xbd   : > { %380 = vrot.lane.b32.xlu1 %v1195_v31, %s997_s15  ;;  %378 = vrot.lane.b32.xlu0 %v1199_v32, %s997_s15 }
  0xc1   : > { %425 = vperm.xlu0 %875, %v422_v34  }
 0x127   : > { %v872_v51 = vpop.permute.xlu1 %871  ;;  %v867_v52 = vpop.permute.xlu0 %866 }
 0x128   : > { %v874_v53 = vunpack.i.h.bf16 %v872_v51  ;;  %v873_v54 = vunpack.i.l.bf16 %v872_v51  ;;  %v869_v55 = vunpack.i.h.bf16 %v867_v52  ;;  %v868_v56 = vunpack.i.l.bf16 %v867_v52 }
 0x12a   : > { %v322_v3 = vsel %vm320_vm10, %v869_v55, %v868_v56  ;;  %v328_v4 = vsel %vm327_vm11, %v873_v54, %v874_v53  ;;  %v329_v5 = vsel %vm327_vm11, %v874_v53, %v873_v54  ;;  %v321_v6 = vsel %vm320_vm10, %v868_v56, %v869_v55 }
 0x12b   : > { %v375_v63 = vpop.permute.xlu1 %374  ;;  %v373_v0 = vpop.permute.xlu0 %372  ;;  %v342_v14 = vsel %vm1236_vm14, %v322_v3, %v328_v4  ;;  %v341_v21 = vsel %vm1232_vm13, %v321_v6, %v329_v5  ;;  %v355_v23 = vsel %vm1222_vm12, %v328_v4, %v322_v3  ;;  %v354_v34 = vsel %vm1240_vm15, %v329_v5, %v321_v6 }
 0x12c   : > { %v376_v24 = vsel %vm320_vm10, %v373_v0, %v375_v63  ;;  %v377_v25 = vsel %vm320_vm10, %v375_v63, %v373_v0  ;;  %v414_v33 = vsel %vm412_vm0, %v342_v14, %v391_v20  ;;  %v413_v36 = vsel %vm412_vm0, %v341_v21, %v390_v22 }
 0x12d   : > { %v420_v38 = vsel %vm412_vm0, %v355_v23, %v409_v13  ;;  %v419_v45 = vsel %vm412_vm0, %v354_v34, %v408_v40 }
 0x12e   : > { %v779_v44 = vpack.c.bf16 %v420_v38, %v418_v43  ;;  %v781_v47 = vpack.c.bf16 %v419_v45, %v417_v46 }
 0x12f   : > { %v381_v18 = vpop.permute.xlu1 %380  ;;  %v379_v19 = vpop.permute.xlu0 %378 }
 0x130   : > { %v382_v26 = vsel %vm327_vm11, %v379_v19, %v381_v18  ;;  %v383_v27 = vsel %vm327_vm11, %v381_v18, %v379_v19 }
 0x131   : > { %v384_v28 = vsel %vm1232_vm13, %v376_v24, %v383_v27  ;;  %v385_v31 = vsel %vm1236_vm14, %v377_v25, %v382_v26  ;;  %v387_v32 = vsel %vm1222_vm12, %v382_v26, %v377_v25  ;;  %v386_v48 = vsel %vm1240_vm15, %v383_v27, %v376_v24 }
 0x132   : > { %v416_v35 = vsel %vm412_vm0, %v385_v31, %v397_v15  ;;  %v415_v37 = vsel %vm412_vm0, %v384_v28, %v396_v9 }
 0x133   : > { %v775_v41 = vpack.c.bf16 %v416_v35, %v414_v33  ;;  %v777_v42 = vpack.c.bf16 %v415_v37, %v413_v36 }
 0x135   : > { %776 = vmatprep.subr.bf16.mxu0 %v775_v41 }
 0x136   : > { %778 = vmatpush1.bf16.msra.mxu0 %v777_v42 }
 0x137   : > { %780 = vmatprep.subr.bf16.mxu0 %v779_v44 }
 0x13a   : > { %782 = vmatpush1.bf16.msra.mxu0 %v781_v47 }
 0x13b   : > { %764 = vmatprep.subr.msk.mxu0 %vm412_vm0, %v387_v32 }
 0x13e   : > { %765 = vmatpush1.msk.msra.mxu0 %vm412_vm0, %v386_v48 }
 0x13f   : > { %766 = vmatmul.mubr.msk.f32.vlgmr.msra.gmra.mrb[0].mxu0 %vm428_vm1, %v421_v2 }
 0x140   : > { %v426_v50 = vpop.permute.xlu0 %425 }
 0x212   : > { %v504_v1 = vpop.f32.mrb[0].mxu0 }
 0x213   : > { %v505_v51 = vadd.f32 %v504_v1, %v426_v50  ;;  %v506_v52 = vpop.f32.mrb[1].mxu0 }
 0x214   : > { %v507_v53 = vadd.f32 %v506_v52, %v426_v50 }
 0x215   : > { %vm509_vm8 = vcmp.gt.f32.partialorder %v505_v51, 0.0  ;;  %v511_v54 = vmul.f32 0.01, %v505_v51 }
 0x216   : > { %vm510_vm9 = vcmp.gt.f32.partialorder %v507_v53, 0.0  ;;  %v512_v55 = vmul.f32 0.01, %v507_v53 }
 0x217   : > { %v1303_v56 = vsel %vm509_vm8, %v505_v51, %v511_v54 }
 0x218   : > { %v1305_v57 = vsel %vm510_vm9, %v507_v53, %v512_v55  ;;  %521 = vrot.lane.b32.xlu0 %v1303_v56, %s995_s9  ;;  %515 = vrot.lane.b32.xlu1 %v1303_v56, %s996_s14 }
 0x219   : > { %v876_v58 = vpack.i.bf16 %v1305_v57, %v1303_v56 }
 0x21c   : > { %877 = vrot.lane.b32.xlu0 %v876_v58, %s998_s16  ;;  %517 = vrot.lane.b32.xlu1 %v1305_v57, %s996_s14 }
 0x220   : > { %523 = vrot.lane.b32.xlu1 %v1305_v57, %s995_s9  ;;  %s257_s9 = scalar_lea.vmem [#allocation5], %s761_s13 }
 0x221   : > { %s684_s14 = sshll.u32 %s257_s9, 4  ;;  %s1404_s14 = int_to_ptr.vmem [resolvable:$true] %s684_s14 }
 0x222   : > { %s925_s18 = scalar_lea.vmem %s1404_s14, 256  ;;  %p932_p2 = scmp.lt.s32.totalorder %s1404_s14, %s930_s20 }
 0x223   : > { %p926_p5 = scmp.ne.s32.totalorder %s1404_s14, %s925_s18  ;;  %p933_p3 = scmp.lt.s32.totalorder %s931_s26, %s925_s18 }
 0x224   : > { %882 = vrot.lane.b32.xlu1 %v876_v58, %s997_s15 }
 0x225   : > { %p927_p10 = pnand %p926_p5, %p1477_p9  ;;  %p934_p4 = por %p933_p3, %p932_p2 }
 0x227   : > { %p928_p12 = pneg %p927_p10 }
 0x229   : > { %p935_p7 = pnand %p934_p4, %p928_p12 }
 0x28a   : > { %v516_v62 = vpop.permute.xlu1 %515  ;;  %v522_v0 = vpop.permute.xlu0 %521 }
 0x28e   : > { %v518_v63 = vpop.permute.xlu1 %517  ;;  %v878_v14 = vpop.permute.xlu0 %877 }
 0x28f   : > { %v519_v4 = vsel %vm280_vm3, %v516_v62, %v518_v63  ;;  %v520_v5 = vsel %vm280_vm3, %v518_v63, %v516_v62  ;;  %v880_v18 = vunpack.i.h.bf16 %v878_v14  ;;  %v879_v30 = vunpack.i.l.bf16 %v878_v14 }
 0x291   : > { %v552_v27 = vsel %vm320_vm10, %v880_v18, %v879_v30  ;;  %v551_v28 = vsel %vm320_vm10, %v879_v30, %v880_v18 }
 0x292   : > { %v524_v3 = vpop.permute.xlu1 %523 }
 0x293   : > { %v525_v6 = vsel %vm287_vm2, %v522_v0, %v524_v3  ;;  %v526_v7 = vsel %vm287_vm2, %v524_v3, %v522_v0  ;;  %vm586_vm2 = vcmask 588800  }
 0x294   : > { %v527_v8 = vsel %vm1155_vm4, %v519_v4, %v526_v7  ;;  %v528_v9 = vsel %vm1159_vm5, %v520_v5, %v525_v6  ;;  %v530_v12 = vsel %vm1185_vm6, %v525_v6, %v520_v5  ;;  %v529_v13 = vsel %vm1189_vm7, %v526_v7, %v519_v4 }
 0x295   : > { %v891_v11 = vpack.i.bf16 %v528_v9, %v527_v8  ;;  %v791_v52 = vpack.c.bf16 %v530_v12, %v1305_v57  ;;  %v793_v54 = vpack.c.bf16 %v529_v13, %v1303_v56  ;;  %v579_v56 = vld [vmem:[%s1448_s4] sm:$0xff] }
 0x296   : > { %v883_v17 = vpop.permute.xlu1 %882 }
 0x297   : > { %892 = vrot.lane.b32.xlu1 %v891_v11, %s997_s15  ;;  %887 = vrot.lane.b32.xlu0 %v891_v11, %s998_s16  ;;  %v885_v29 = vunpack.i.h.bf16 %v883_v17  ;;  %v884_v15 = vunpack.i.l.bf16 %v883_v17 }
 0x299   : > { %v557_v21 = vsel %vm327_vm11, %v884_v15, %v885_v29  ;;  %v558_v22 = vsel %vm327_vm11, %v885_v29, %v884_v15 }
 0x29a   : > { %v560_v39 = vsel %vm1236_vm14, %v552_v27, %v557_v21  ;;  %v559_v41 = vsel %vm1232_vm13, %v551_v28, %v558_v22  ;;  %v562_v10 = vsel %vm1222_vm12, %v557_v21, %v552_v27  ;;  %v561_v55 = vsel %vm1240_vm15, %v558_v22, %v551_v28 }
 0x29b   : > { %565 = vrot.lane.b32.xlu1 %v530_v12, %s998_s16  ;;  %563 = vrot.lane.b32.xlu0 %v529_v13, %s998_s16 }
 0x29f   : > { %571 = vrot.lane.b32.xlu1 %v530_v12, %s997_s15  ;;  %569 = vrot.lane.b32.xlu0 %v529_v13, %s997_s15 }
 0x2a3   : > { %583 = vperm.xlu0 %875, %v580_v16  }
 0x309   : > { %v888_v19 = vpop.permute.xlu0 %887  ;;  %v893_v20 = vpop.permute.xlu1 %892 }
 0x30a   : > { %v890_v23 = vunpack.i.h.bf16 %v888_v19  ;;  %v889_v24 = vunpack.i.l.bf16 %v888_v19  ;;  %v895_v25 = vunpack.i.h.bf16 %v893_v20  ;;  %v894_v26 = vunpack.i.l.bf16 %v893_v20 }
 0x30c   : > { %v536_v31 = vsel %vm320_vm10, %v890_v23, %v889_v24  ;;  %v541_v33 = vsel %vm327_vm11, %v894_v26, %v895_v25  ;;  %v535_v34 = vsel %vm320_vm10, %v889_v24, %v890_v23  ;;  %v542_v35 = vsel %vm327_vm11, %v895_v25, %v894_v26 }
 0x30d   : > { %v564_v36 = vpop.permute.xlu0 %563  ;;  %v566_v37 = vpop.permute.xlu1 %565  ;;  %v544_v38 = vsel %vm1236_vm14, %v536_v31, %v541_v33  ;;  %v543_v40 = vsel %vm1232_vm13, %v535_v34, %v542_v35  ;;  %v546_v53 = vsel %vm1222_vm12, %v541_v33, %v536_v31  ;;  %v545_v60 = vsel %vm1240_vm15, %v542_v35, %v535_v34 }
 0x30e   : > { %v783_v42 = vpack.c.bf16 %v560_v39, %v544_v38  ;;  %v785_v43 = vpack.c.bf16 %v559_v41, %v543_v40  ;;  %v567_v46 = vsel %vm320_vm10, %v564_v36, %v566_v37  ;;  %v568_v47 = vsel %vm320_vm10, %v566_v37, %v564_v36 }
 0x30f   : > { %v795_v59 = vpack.c.bf16 %v562_v10, %v546_v53  ;;  %v797_v57 = vpack.c.bf16 %v561_v55, %v545_v60 }
 0x310   : > { %784 = vmatprep.subr.bf16.mxu1 %v783_v42 }
 0x311   : > { %v570_v44 = vpop.permute.xlu0 %569  ;;  %v572_v45 = vpop.permute.xlu1 %571  ;;  %786 = vmatpush1.bf16.msra.mxu1 %v785_v43 }
 0x312   : > { %v573_v32 = vsel %vm327_vm11, %v570_v44, %v572_v45  ;;  %v574_v2 = vsel %vm327_vm11, %v572_v45, %v570_v44 }
 0x313   : > { %v575_v48 = vsel %vm1232_vm13, %v567_v46, %v574_v2  ;;  %v576_v50 = vsel %vm1236_vm14, %v568_v47, %v573_v32  ;;  %v578_v58 = vsel %vm1222_vm12, %v573_v32, %v568_v47  ;;  %v577_v62 = vsel %vm1240_vm15, %v574_v2, %v567_v46 }
 0x314   : > { %v787_v1 = vpack.c.bf16 %v528_v9, %v576_v50  ;;  %v789_v51 = vpack.c.bf16 %v527_v8, %v575_v48 }
 0x316   : > { %788 = vmatprep.subr.bf16.mxu1 %v787_v1 }
 0x317   : > { %790 = vmatpush1.bf16.msra.mxu1 %v789_v51 }
 0x318   : > { %792 = vmatprep.subr.bf16.mxu1 %v791_v52 }
 0x31b   : > { %794 = vmatpush1.bf16.msra.mxu1 %v793_v54 }
 0x31c   : > { %796 = vmatprep.subr.bf16.mxu1 %v795_v59 }
 0x31f   : > { %798 = vmatpush1.bf16.msra.mxu1 %v797_v57 }
 0x320   : > { %606 = vmatprep.subr.mxu1 %v578_v58 }
 0x322   : > { %v584_v63 = vpop.permute.xlu0 %583 }
 0x323   : > { %607 = vmatpush1.msra.mxu1 %v577_v62 }
 0x324   : > { %767 = vmatmul.mubr.msk.f32.vlgmr.msra.gmra.mrb[0].mxu1 %vm586_vm2, %v579_v56 }
 0x3f7   : > { %v656_v0 = vpop.f32.mrb[0].mxu1 }
 0x3f8   : > { %v657_v3 = vadd.f32 %v656_v0, %v584_v63  ;;  %v658_v4 = vpop.f32.mrb[1].mxu1 }
 0x3f9   : > { %v659_v5 = vadd.f32 %v658_v4, %v584_v63 }
 0x3fa   : > { %vm661_vm3 = vcmp.gt.f32.partialorder %v657_v3, 0.0  ;;  %v663_v49 = vmul.f32 0.01, %v657_v3 }
 0x3fb   : > { %vm662_vm4 = vcmp.gt.f32.partialorder %v659_v5, 0.0  ;;  %v664_v6 = vmul.f32 0.01, %v659_v5 }
 0x3fc   : > { %v665_v7 = vsel %vm661_vm3, %v657_v3, %v663_v49 }
 0x3fd   : > { %667 = vst [vmem:[%s257_s9] sm:$0xff] %v665_v7  ;;  %v666_v61 = vsel %vm662_vm4, %v659_v5, %v664_v6 }
 0x3fe   : > { %668 = vst [vmem:[%s257_s9 + $0x8] sm:$0xff] %v666_v61 }
 0x3ff   : > { %938 = shalt.err (!%p935_p7)
}
 0x400   : > { %s939_s28 = scalar_lea.hbm %s1402_s17, 256  ;;  %s943_s12 = scalar_lea.hbm %s1450_s6, 512 }
 0x401   : > { %p940_p8 = scmp.ne.s32.totalorder %s1402_s17, %s939_s28  ;;  %p944_p1 = scmp.lt.u32.totalorder %s1402_s17, %s1450_s6 }
 0x402   : > { %p945_p0 = scmp.lt.u32.totalorder %s943_s12, %s939_s28  ;;  %p947_p5 = scmp.lt.u32.totalorder %s939_s28, %s1402_s17 }
 0x403   : > { %p941_p11 = pnand %p940_p8, %p1477_p9 }
 0x404   : > { %p946_p6 = por %p945_p0, %p944_p1 }
 0x405   : > { %p942_p13 = pneg %p941_p11 }
 0x406   : > { %p948_p10 = por %p947_p5, %p946_p6 }
 0x408   : > { %p949_p12 = pnand %p948_p10, %p942_p13 }
 0x40a   : > { %952 = shalt.err (!%p949_p12)
}
 0x40b   : > { %803 = dma.vmem_to_hbm [thread:$0]  (%p1477_p9), %s1404_s14, 256, %s1402_s17, %s670_s25  }
 0x40c PF: > { %p815_p2 = scmp.ge.s32.totalorder %s991_s24, 2  ;;  %s696_s9 = sand.u32 1, %s979_s21  }
 0x40d   : > { %p1478_p3 = scmp.ne.s32.totalorder %s1455_s8, 0  ;;  %s697_s15 = scalar_lea.sflag [#allocation4], %s696_s9 }
 0x40f   : > { %p810_p4 = pnand %p815_p2, %p1478_p3 }
 0x411   : > { %974 = dma.done.wait (!%p810_p4), %s697_s15, 256  }
 0x412   : > { %976 = vsyncadd (!%p810_p4), %s697_s15, 4294967040  ;;  %p17_p7 = scmp.ge.s32.totalorder %s1061_s27, 4   ;;  %s1479_s21 = smov %s983_s22 }
 0x413   : > { %s1480_s22 = smov %s987_s23  ;;  %s1481_s23 = smov %s1072_s30 }
 0x414   : > { %s1482_s24 = smov %s1061_s27  ;;  %19 = sbr.rel (!%p17_p7) target bundleno = 4 (0x4), region = 85 }
 0x41b   :  { %702 = vsyncpa [#allocation3], 1 }
 0x41c   :  { %704 = vsyncpa [#allocation3 + $0x1], 1 }
 0x41d   :  { %705 = vsyncpa [#allocation4], 1 }
 0x41e   :  { %707 = vsyncpa [#allocation4 + $0x1], 1 }

</bundles_post_ra>
